<compile_context>
chip_gen: v7x
topology: tpu7x:2x2x1
jax: 0.10.0
libtpu: 0.0.40
codegen_flags: <defaults>
</compile_context>

<pallas_src>
import functools

import jax
import jax.numpy as jnp
from jax.experimental import pallas as pl
from jax.experimental.pallas import tpu as pltpu


def _round_up(v, m):
    return (v + m - 1) // m * m


def _vmem_budget_bytes():
    """Usable scoped-VMEM budget, derived from the chip's physical capacity."""
    cap = 64 << 20  # conservative fallback (v7x physical VMEM per TensorCore)
    try:
        info = pltpu.get_tpu_info()
        cap = int(getattr(info, "vmem_capacity_bytes", cap)) or cap
    except Exception:
        pass
    return max(32 << 20, min(96 << 20, int(cap * 0.7)))


def _pick_tile(hw, c, itemsize, target_bytes):
    """Lane-tile width T (multiple of 128): ~target bytes per (C, T) x tile,
    floored so each DMA'd row segment is >= ~2 KiB, capped at the HW extent."""
    lanes_cap = _round_up(hw, 128)
    t_min = _round_up(max(2048 // itemsize, 128), 128)   # >= 2 KiB per row segment
    t = (target_bytes // max(1, c * itemsize)) // 128 * 128
    t = max(t, t_min, 128)
    return min(t, lanes_cap)


# ------------------------------ kernels ------------------------------------


def _masked_partial_sum(x_ref, base, hw, c, t):
    """Sum a (c, t) tile over lanes into a (c, 128) f32 partial.

    Lanes whose global HW index (base + lane) is >= hw contribute zero, so
    ragged final tiles and fully out-of-range (clamped) tiles are correct.
    Pure 128-lane VPU adds -> the XLU cost never scales with T.
    """
    lane = jax.lax.broadcasted_iota(jnp.int32, (1, 128), 1)
    n_chunks = t // 128

    def add_chunk(i, acc):
        off = i * 128
        if not isinstance(off, int):
            off = pl.multiple_of(off, 128)
        xc = x_ref[:, pl.ds(off, 128)].astype(jnp.float32)
        return acc + jnp.where(base + off + lane < hw, xc, 0.0)

    acc = jnp.zeros((c, 128), jnp.float32)
    if n_chunks <= 32:                       # short: unroll at trace time
        for i in range(n_chunks):
            acc = add_chunk(i, acc)
        return acc
    return jax.lax.fori_loop(0, n_chunks, add_chunk, acc, unroll=8)


def _sum_kernel(x_ref, psum_ref, *, hw, tile, nt_inner):
    """Accumulate lane-masked (C, 128) partial sums over HW tiles."""
    t_id = pl.program_id(2)

    @pl.when(t_id == 0)
    def _():
        psum_ref[...] = jnp.zeros_like(psum_ref)

    # un-clamped global lane base; >= hw for overhang tiles => fully masked
    base = (pl.program_id(1) * nt_inner + t_id) * tile
    psum_ref[...] += _masked_partial_sum(x_ref, base, hw, psum_ref.shape[0], tile)


def _apply_kernel(x_ref, chn_ref, wsp_ref, o_ref):
    """out = x * (chn_scale + sigmoid(wsp @ x)) for one (C, T) tile."""
    xt = x_ref[...]                                            # (C, T) native dtype
    spa = jnp.dot(wsp_ref[...], xt,
                  preferred_element_type=jnp.float32)          # (1, T) on the MXU
    scale = chn_ref[...] + jax.nn.sigmoid(spa)                 # (C,1)+(1,T) -> (C,T)
    o_ref[...] = (xt * scale).astype(o_ref.dtype)


def _fused_kernel(x_ref, w1t_ref, b1_ref, w2_ref, b2_ref, wsp_ref, o_ref, *, hw):
    """Single-pass SCSE for one (C, HW) batch slab resident in VMEM."""
    xt = x_ref[...]                                            # (C, HW) native dtype
    # channel squeeze: global average pool (f32 accumulation)
    mean = jnp.sum(xt, axis=1, keepdims=True,
                   dtype=jnp.float32) * (1.0 / hw)             # (C, 1)
    # channel excitation MLP in "column" orientation (no transposes needed)
    h = jnp.sum(w1t_ref[...] * mean, axis=0, keepdims=True) + b1_ref[...]   # (1, Cr)
    h = jnp.maximum(h, 0.0)
    chn = jax.nn.sigmoid(
        jnp.sum(w2_ref[...] * h, axis=1, keepdims=True) + b2_ref[...])      # (C, 1)
    # spatial squeeze: 1x1 conv on the MXU, sigmoid on the EUP
    spa = jnp.dot(wsp_ref[...], xt, preferred_element_type=jnp.float32)     # (1, HW)
    scale = chn + jax.nn.sigmoid(spa)                                        # (C, HW)
    o_ref[...] = (xt * scale).astype(o_ref.dtype)


# ------------------------------ wrapper -------------------------------------


def scse_block(x, w1, b1, w2, b2, w_sp, *, force_path=None, tile_bytes=None):
    """SCSEBlock forward.

    x    : (B, C, H, W) NCHW, any float dtype (output matches x.dtype)
    w1   : (Cr, C)  nn.Linear(C, Cr).weight      b1 : (Cr,)
    w2   : (C, Cr)  nn.Linear(Cr, C).weight      b2 : (C,)
    w_sp : (1, C, 1, 1) nn.Conv2d(C, 1, 1, bias=False).weight
    force_path: None (auto) | "fused" | "tiled"   (testing hook)
    """
    B, C, H, W = x.shape
    HW = H * W
    io_dtype = x.dtype
    itemsize = jnp.dtype(io_dtype).itemsize
    Cr = w1.shape[0]
    f32 = jnp.float32

    vmem_budget = _vmem_budget_bytes()
    x2 = x.reshape(B, C, HW)                         # free (metadata only)
    wsp_row = w_sp.reshape(1, C).astype(io_dtype)

    # dispatch: single-pass slab-resident path vs two-pass tiled path
    cp8, hwp = _round_up(C, 8), _round_up(HW, 128)
    slab_native = cp8 * hwp * itemsize
    fused_need = 4 * slab_native + 3 * cp8 * hwp * 4 + (1 << 20)  # 2x(in+out) + f32 temps
    use_fused = fused_need <= vmem_budget
    if force_path is not None:
        use_fused = force_path == "fused"

    if use_fused:
        out = pl.pallas_call(
            functools.partial(_fused_kernel, hw=HW),
            out_shape=jax.ShapeDtypeStruct((B, C, HW), io_dtype),
            grid=(B,),
            in_specs=[
                pl.BlockSpec((None, C, HW), lambda b: (b, 0, 0)),
                pl.BlockSpec((C, Cr), lambda b: (0, 0)),
                pl.BlockSpec((1, Cr), lambda b: (0, 0)),
                pl.BlockSpec((C, Cr), lambda b: (0, 0)),
                pl.BlockSpec((C, 1), lambda b: (0, 0)),
                pl.BlockSpec((1, C), lambda b: (0, 0)),
            ],
            out_specs=pl.BlockSpec((None, C, HW), lambda b: (b, 0, 0)),
            compiler_params=pltpu.CompilerParams(
                dimension_semantics=("parallel",),
                vmem_limit_bytes=vmem_budget),
            cost_estimate=pl.CostEstimate(
                flops=int(5 * B * C * HW),
                transcendentals=int(B * (HW + 2 * C)),
                bytes_accessed=int(2 * B * C * HW * itemsize)),
        )(x2,
          w1.astype(f32).T,                  # (C, Cr)
          b1.astype(f32).reshape(1, Cr),     # (1, Cr)
          w2.astype(f32),                    # (C, Cr)
          b2.astype(f32).reshape(C, 1),      # (C, 1)
          wsp_row)
        return out.reshape(B, C, H, W)

    # ------------------------- two-pass tiled path -------------------------
    target = tile_bytes if tile_bytes is not None else max(
        1 << 20, min(8 << 20, vmem_budget // 12))
    T = _pick_tile(HW, C, itemsize, target)
    n_t = pl.cdiv(HW, T)
    # split the HW reduction over a second "parallel" axis at small batch so
    # pass 1 can feed both v7x TensorCores (harmless on 1-TC chips).
    npar = 2 if (B < 4 and n_t >= 2) else 1
    nt_inner = pl.cdiv(n_t, npar)

    def x_sum_map(b, p, t):
        # clamp overhanging tiles onto the last real tile; the kernel's lane
        # mask (built from the un-clamped index) zeroes their contribution.
        return (b, 0, jnp.minimum(p * nt_inner + t, n_t - 1))

    partials = pl.pallas_call(
        functools.partial(_sum_kernel, hw=HW, tile=T, nt_inner=nt_inner),
        out_shape=jax.ShapeDtypeStruct((B, npar, C, 128), f32),
        grid=(B, npar, nt_inner),
        in_specs=[pl.BlockSpec((None, C, T), x_sum_map)],
        out_specs=pl.BlockSpec((None, None, C, 128), lambda b, p, t: (b, p, 0, 0)),
        compiler_params=pltpu.CompilerParams(
            dimension_semantics=("parallel", "parallel", "arbitrary"),
            vmem_limit_bytes=vmem_budget),
        cost_estimate=pl.CostEstimate(
            flops=int(2 * B * C * HW),
            transcendentals=0,
            bytes_accessed=int(B * C * HW * itemsize + B * npar * C * 128 * 4)),
    )(x2)

    # tiny channel MLP on the (B, C) means -- negligible, plain JAX f32
    mean = jnp.sum(partials, axis=(1, 3)) * (1.0 / HW)              # (B, C)
    h = jnp.maximum(mean @ w1.astype(f32).T + b1.astype(f32), 0.0)  # (B, Cr)
    chn = jax.nn.sigmoid(h @ w2.astype(f32).T + b2.astype(f32))     # (B, C)
    chn3 = chn[:, :, None]                                          # (B, C, 1)

    out = pl.pallas_call(
        _apply_kernel,
        out_shape=jax.ShapeDtypeStruct((B, C, HW), io_dtype),
        grid=(B, n_t),
        in_specs=[
            pl.BlockSpec((None, C, T), lambda b, t: (b, 0, t)),
            pl.BlockSpec((None, C, 1), lambda b, t: (b, 0, 0)),
            pl.BlockSpec((1, C), lambda b, t: (0, 0)),
        ],
        out_specs=pl.BlockSpec((None, C, T), lambda b, t: (b, 0, t)),
        compiler_params=pltpu.CompilerParams(
            dimension_semantics=("parallel", "parallel"),
            vmem_limit_bytes=vmem_budget),
        cost_estimate=pl.CostEstimate(
            flops=int(4 * B * C * HW),
            transcendentals=int(B * HW),
            bytes_accessed=int(2 * B * C * HW * itemsize)),
    )(x2, chn3, wsp_row)
    return out.reshape(B, C, H, W)


# ------------------------------ reference & test ----------------------------


def _reference(x, w1, b1, w2, b2, w_sp):
    """Plain-JAX reference mirroring the PyTorch forward exactly."""
    B, C, H, W = x.shape
    xf = x.astype(jnp.float32)
    chn = jnp.mean(xf, axis=(2, 3))                              # (B, C) avg_pool
    chn = jnp.maximum(chn @ w1.astype(jnp.float32).T + b1, 0.0)  # Linear + ReLU
    chn = jax.nn.sigmoid(chn @ w2.astype(jnp.float32).T + b2)    # Linear + Sigmoid
    chn_se = xf * chn[:, :, None, None]
    spa = jnp.einsum("bchw,c->bhw", xf, w_sp.reshape(C).astype(jnp.float32))
    spa_se = xf * jax.nn.sigmoid(spa)[:, None, :, :]
    return (chn_se + spa_se).astype(x.dtype)


if __name__ == "__main__":
    def run_case(tag, key, shape, reduction, force_path=None, tile_bytes=None):
        B, C, H, W = shape
        Cr = max(1, C // reduction)
        kx, k1, k2, k3, k4, k5 = jax.random.split(key, 6)
        x = jax.random.normal(kx, (B, C, H, W), dtype=jnp.float32)
        w1 = jax.random.normal(k1, (Cr, C), dtype=jnp.float32) * 0.1
        b1 = jax.random.normal(k2, (Cr,), dtype=jnp.float32) * 0.1
        w2 = jax.random.normal(k3, (C, Cr), dtype=jnp.float32) * 0.1
        b2 = jax.random.normal(k4, (C,), dtype=jnp.float32) * 0.1
        w_sp = jax.random.normal(k5, (1, C, 1, 1), dtype=jnp.float32) * 0.1

        out = jax.block_until_ready(
            scse_block(x, w1, b1, w2, b2, w_sp,
                       force_path=force_path, tile_bytes=tile_bytes))
        ref = _reference(x, w1, b1, w2, b2, w_sp)
        assert out.shape == x.shape and out.dtype == x.dtype, tag
        assert jnp.allclose(out, ref, atol=2e-3, rtol=2e-3), f"mismatch: {tag}"

    root = jax.random.PRNGKey(0)
    k0, k1, k2, k3 = jax.random.split(root, 4)
    # aligned shapes, auto dispatch (single-pass fused path)
    run_case("fused/aligned", k0, (2, 32, 16, 16), 16)
    # unaligned C (not %8) and HW (not %128), fused path
    run_case("fused/unaligned", k1, (2, 20, 15, 13), 16)
    # two-pass tiled path: multi-tile accumulation, ragged final tile, clamped
    # overhang tile, and the dual-core (npar=2) pass-1 split
    run_case("tiled/unaligned", k2, (2, 20, 36, 36), 16,
             force_path="tiled", tile_bytes=40 * 1024)
    # two-pass tiled path exercising the rolled (fori_loop) lane-chunk sum
    run_case("tiled/long-rows", k3, (2, 8, 72, 72), 4,
             force_path="tiled", tile_bytes=1 << 20)
    print("KERNEL_OK")
</pallas_src>

<mosaic_0001>
module attributes {stable_mosaic.version = 11 : i64} {
  func.func @_fused_kernel(%arg0: i32, %arg1: memref<1x32x256xf32, #tpu.memory_space<vmem>>, %arg2: memref<32x2xf32, #tpu.memory_space<vmem>>, %arg3: memref<1x2xf32, #tpu.memory_space<vmem>>, %arg4: memref<32x2xf32, #tpu.memory_space<vmem>>, %arg5: memref<32x1xf32, #tpu.memory_space<vmem>>, %arg6: memref<1x32xf32, #tpu.memory_space<vmem>>, %arg7: memref<1x32x256xf32, #tpu.memory_space<vmem>>) attributes {dimension_semantics = [#tpu.dimension_semantics<parallel>], iteration_bounds = array<i64: 2>, scalar_prefetch = 0 : i64, scratch_operands = 0 : i64, tpu.core_type = #tpu.core_type<tc>, window_params = [{transform_indices = @transform_0, window_bounds = array<i64: 1, 32, 256>}, {pipeline_mode = #tpu.pipeline_mode<synchronous>, transform_indices = @transform_1, window_bounds = array<i64: 32, 2>}, {pipeline_mode = #tpu.pipeline_mode<synchronous>, transform_indices = @transform_2, window_bounds = array<i64: 1, 2>}, {pipeline_mode = #tpu.pipeline_mode<synchronous>, transform_indices = @transform_3, window_bounds = array<i64: 32, 2>}, {pipeline_mode = #tpu.pipeline_mode<synchronous>, transform_indices = @transform_4, window_bounds = array<i64: 32, 1>}, {pipeline_mode = #tpu.pipeline_mode<synchronous>, transform_indices = @transform_5, window_bounds = array<i64: 1, 32>}, {transform_indices = @transform_6, window_bounds = array<i64: 1, 32, 256>}]} {
    %c0 = arith.constant 0 : index
    %c0_0 = arith.constant 0 : index
    %c0_1 = arith.constant 0 : index
    %0 = vector.load %arg1[%c0, %c0_0, %c0_1] : memref<1x32x256xf32, #tpu.memory_space<vmem>>, vector<1x32x256xf32>
    %1 = vector.shape_cast %0 : vector<1x32x256xf32> to vector<32x256xf32>
    %cst = arith.constant dense<0.000000e+00> : vector<32xf32>
    %2 = vector.multi_reduction <add>, %1, %cst [1] : vector<32x256xf32> to vector<32xf32>
    %3 = vector.shape_cast %2 : vector<32xf32> to vector<32x1xf32>
    %cst_2 = arith.constant 3.906250e-03 : f32
    %4 = vector.broadcast %cst_2 : f32 to vector<32x1xf32>
    %5 = arith.mulf %3, %4 : vector<32x1xf32>
    %c0_3 = arith.constant 0 : index
    %c0_4 = arith.constant 0 : index
    %6 = vector.load %arg2[%c0_3, %c0_4] : memref<32x2xf32, #tpu.memory_space<vmem>>, vector<32x2xf32>
    %7 = vector.broadcast %5 : vector<32x1xf32> to vector<32x2xf32>
    %8 = arith.mulf %6, %7 : vector<32x2xf32>
    %cst_5 = arith.constant dense<0.000000e+00> : vector<2xf32>
    %9 = vector.multi_reduction <add>, %8, %cst_5 [0] : vector<32x2xf32> to vector<2xf32>
    %10 = vector.shape_cast %9 : vector<2xf32> to vector<1x2xf32>
    %c0_6 = arith.constant 0 : index
    %c0_7 = arith.constant 0 : index
    %11 = vector.load %arg3[%c0_6, %c0_7] : memref<1x2xf32, #tpu.memory_space<vmem>>, vector<1x2xf32>
    %12 = arith.addf %10, %11 : vector<1x2xf32>
    %cst_8 = arith.constant 0.000000e+00 : f32
    %13 = vector.broadcast %cst_8 : f32 to vector<1x2xf32>
    %14 = arith.maximumf %12, %13 : vector<1x2xf32>
    %c0_9 = arith.constant 0 : index
    %c0_10 = arith.constant 0 : index
    %15 = vector.load %arg4[%c0_9, %c0_10] : memref<32x2xf32, #tpu.memory_space<vmem>>, vector<32x2xf32>
    %16 = vector.broadcast %14 : vector<1x2xf32> to vector<32x2xf32>
    %17 = arith.mulf %15, %16 : vector<32x2xf32>
    %cst_11 = arith.constant dense<0.000000e+00> : vector<32xf32>
    %18 = vector.multi_reduction <add>, %17, %cst_11 [1] : vector<32x2xf32> to vector<32xf32>
    %19 = vector.shape_cast %18 : vector<32xf32> to vector<32x1xf32>
    %c0_12 = arith.constant 0 : index
    %c0_13 = arith.constant 0 : index
    %20 = vector.load %arg5[%c0_12, %c0_13] : memref<32x1xf32, #tpu.memory_space<vmem>>, vector<32x1xf32>
    %21 = arith.addf %19, %20 : vector<32x1xf32>
    %22 = arith.negf %21 : vector<32x1xf32>
    %23 = math.exp %22 : vector<32x1xf32>
    %cst_14 = arith.constant 1.000000e+00 : f32
    %24 = vector.broadcast %cst_14 : f32 to vector<32x1xf32>
    %25 = arith.addf %24, %23 : vector<32x1xf32>
    %26 = arith.divf %24, %25 : vector<32x1xf32>
    %c0_15 = arith.constant 0 : index
    %c0_16 = arith.constant 0 : index
    %27 = vector.load %arg6[%c0_15, %c0_16] : memref<1x32xf32, #tpu.memory_space<vmem>>, vector<1x32xf32>
    %cst_17 = arith.constant dense<0.000000e+00> : vector<1x256xf32>
    %28 = tpu.matmul %27, %1, %cst_17 {dimension_numbers = #tpu.dot_dimension_numbers<[1], [0], [0], [1], [0, 0, 1, 1], [], []>} : vector<1x32xf32>, vector<32x256xf32>, vector<1x256xf32> -> vector<1x256xf32>
    %29 = arith.negf %28 : vector<1x256xf32>
    %30 = math.exp %29 : vector<1x256xf32>
    %cst_18 = arith.constant 1.000000e+00 : f32
    %31 = vector.broadcast %cst_18 : f32 to vector<1x256xf32>
    %32 = arith.addf %31, %30 : vector<1x256xf32>
    %33 = arith.divf %31, %32 : vector<1x256xf32>
    %34 = vector.broadcast %26 : vector<32x1xf32> to vector<32x256xf32>
    %35 = vector.broadcast %33 : vector<1x256xf32> to vector<32x256xf32>
    %36 = arith.addf %34, %35 : vector<32x256xf32>
    %37 = arith.mulf %1, %36 : vector<32x256xf32>
    %c0_19 = arith.constant 0 : index
    %c0_20 = arith.constant 0 : index
    %c0_21 = arith.constant 0 : index
    %38 = vector.load %arg7[%c0_19, %c0_20, %c0_21] : memref<1x32x256xf32, #tpu.memory_space<vmem>>, vector<1x32x256xf32>
    %39 = vector.shape_cast %38 : vector<1x32x256xf32> to vector<32x256xf32>
    %40 = vector.shape_cast %37 : vector<32x256xf32> to vector<1x32x256xf32>
    tpu.vector_store %arg7[%c0_19, %c0_20, %c0_21], %40 {strides = array<i32>} : memref<1x32x256xf32, #tpu.memory_space<vmem>>, vector<1x32x256xf32>,
    return
  }
  func.func @transform_0(%arg0: i32) -> (i32, i32, i32) {
    %c0_i32 = arith.constant 0 : i32
    %c0_i32_0 = arith.constant 0 : i32
    %c0_i32_1 = arith.constant 0 : i32
    return %arg0, %c0_i32, %c0_i32_0 : i32, i32, i32
  }
  func.func @transform_1(%arg0: i32) -> (i32, i32) {
    %c0_i32 = arith.constant 0 : i32
    %c0_i32_0 = arith.constant 0 : i32
    %c0_i32_1 = arith.constant 0 : i32
    return %c0_i32, %c0_i32_0 : i32, i32
  }
  func.func @transform_2(%arg0: i32) -> (i32, i32) {
    %c0_i32 = arith.constant 0 : i32
    %c0_i32_0 = arith.constant 0 : i32
    %c0_i32_1 = arith.constant 0 : i32
    return %c0_i32, %c0_i32_0 : i32, i32
  }
  func.func @transform_3(%arg0: i32) -> (i32, i32) {
    %c0_i32 = arith.constant 0 : i32
    %c0_i32_0 = arith.constant 0 : i32
    %c0_i32_1 = arith.constant 0 : i32
    return %c0_i32, %c0_i32_0 : i32, i32
  }
  func.func @transform_4(%arg0: i32) -> (i32, i32) {
    %c0_i32 = arith.constant 0 : i32
    %c0_i32_0 = arith.constant 0 : i32
    %c0_i32_1 = arith.constant 0 : i32
    return %c0_i32, %c0_i32_0 : i32, i32
  }
  func.func @transform_5(%arg0: i32) -> (i32, i32) {
    %c0_i32 = arith.constant 0 : i32
    %c0_i32_0 = arith.constant 0 : i32
    %c0_i32_1 = arith.constant 0 : i32
    return %c0_i32, %c0_i32_0 : i32, i32
  }
  func.func @transform_6(%arg0: i32) -> (i32, i32, i32) {
    %c0_i32 = arith.constant 0 : i32
    %c0_i32_0 = arith.constant 0 : i32
    %c0_i32_1 = arith.constant 0 : i32
    return %arg0, %c0_i32, %c0_i32_0 : i32, i32, i32
  }
}

</mosaic_0001>

<bundles_post_ra>
// kernel: tpu_custom_call.1
= control target key start
LH: loop header
LB: loop body
LE: loop exit
PB: predicated region body
PF: predicated region fallthrough
CT: control target
= control target key end

     0   :  { %11 = vsyncpa [#allocation3], 0  ;;  %s1113_s0 = inlined_call_operand.hbm [shape: f32[2,32,256], index: 0, kind: input, shape index: {}]   ;;  %s1114_s1 = inlined_call_operand.vmem [shape: f32[32,2], index: 1, kind: input, shape index: {}]   ;;  %s1115_s2 = inlined_call_operand.vmem [shape: f32[1,2], index: 2, kind: input, shape index: {}]   ;;  %s1116_s3 = inlined_call_operand.vmem [shape: f32[32,2], index: 3, kind: input, shape index: {}]   ;;  %s1117_s4 = inlined_call_operand.vmem [shape: f32[32,1], index: 4, kind: input, shape index: {}]   ;;  %s1118_s5 = inlined_call_operand.vmem [shape: f32[1,32], index: 5, kind: input, shape index: {}]   ;;  %s1119_s6 = inlined_call_operand.hbm [shape: f32[2,32,256], index: 6, kind: output, shape index: {}]  }
   0x1   :  { %13 = vsyncpa [#allocation3 + $0x1], 0 }
   0x2   :  { %14 = vsyncpa [#allocation4], 0 }
   0x3   :  { %16 = vsyncpa [#allocation4 + $0x1], 0  ;;  %s852_s21 = smov 0   ;;  %s854_s22 = smov 0  }
   0x4   :  { %s856_s23 = smov 0   ;;  %s858_s24 = smov 0  }
   0x5 LB: > { %s873_s25 = sadd.s32 4294967295, %s807_s24   ;;  %s602_s26 = sadd.s32 4294967294, %s807_s24   ;;  %s807_s24 = sphi %s858_s24, %s1132_s24   ;;  %s803_s23 = sphi %s856_s23, %s1131_s23   ;;  %s799_s22 = sphi %s854_s22, %s1130_s22   ;;  %s795_s21 = sphi %s852_s21, %s1129_s21  }
   0x6   : > { %s877_s27 = sadd.s32 1, %s807_s24   ;;  %s29_s28 = sadd.s32 1, %s803_s23 }
   0x7   : > { %s26_s29 = ssub.s32 %s807_s24, %s877_s27  ;;  %p36_p0 = scmp.ne.s32.totalorder %s803_s23, %s799_s22 }
   0x8   : > { %p27_p1 = scmp.eq.s32.totalorder %s26_s29, 0  ;;  %p37_p2 = scmp.eq.s32.totalorder %s807_s24, 0 }
   0x9   : > { %p42_p3 = scmp.ne.s32.totalorder %s799_s22, %s795_s21  ;;  %p43_p4 = scmp.eq.s32.totalorder %s873_s25, 0 }
   0xa   : > { %s889_s30 = scalar_select %p27_p1, %s803_s23, %s29_s28  }
   0xb   : > { %p891_p5 = por %p37_p2, %p36_p0  ;;  %p895_p6 = por %p43_p4, %p42_p3 }
   0xc   : > { %p171_p7 = scmp.eq.s32.totalorder %s873_s25, 1  ;;  %p177_p8 = scmp.eq.s32.totalorder %s602_s26, 1 }
   0xd   : > { %p645_p10 = scmp.lt.s32.totalorder %s807_s24, 2  ;;  %s212_s11 = sand.u32 1, %s803_s23  }
   0xe   : > { %p902_p11 = por %p171_p7, %p36_p0  ;;  %p906_p12 = por %p177_p8, %p42_p3 }
   0xf   : > { %s623_s12 = sshll.u32 %s807_s24, 10  ;;  %s605_s13 = sshll.u32 %s212_s11, 6 }
  0x10   : > { %s1123_s9 = scalar_select %p902_p11, 1, 0 }
  0x11   : > { %s1124_s10 = scalar_select %p906_p12, 1, 0 }
  0x12   : > { %s915_s16 = scalar_lea.hbm %s1113_s0, %s623_s12  ;;  %s216_s17 = scalar_lea.vmem [#allocation2], %s605_s13 }
  0x13   : > { %s223_s18 = sshll.u32 %s216_s17, 4  ;;  %p919_p13 = pnand %p645_p10, %p891_p5  ;;  %s923_s18 = int_to_ptr.vmem [resolvable:$true] %s223_s18 }
  0x14   : > { %s925_s20 = scalar_lea.sflag [#allocation3], %s212_s11  ;;  %s711_s26 = scalar_lea.hbm %s915_s16, 1024 }
  0x15   : > { %p712_p0 = scmp.ne.s32.totalorder %s915_s16, %s711_s26  ;;  %p713_p1 = pneg %p919_p13 }
  0x16   : > { %s716_s7 = scalar_lea.hbm %s1113_s0, 2048  ;;  %p717_p4 = scmp.lt.u32.totalorder %s915_s16, %s1113_s0 }
  0x17   : > { %p714_p2 = pnand %p713_p1, %p712_p0  ;;  %p718_p5 = scmp.lt.u32.totalorder %s716_s7, %s711_s26 }
  0x18   : > { %p720_p8 = scmp.lt.u32.totalorder %s711_s26, %s915_s16 }
  0x19   : > { %p715_p3 = pneg %p714_p2  ;;  %p719_p7 = por %p718_p5, %p717_p4 }
  0x1b   : > { %p721_p10 = por %p720_p8, %p719_p7 }
  0x1d   : > { %p722_p9 = pnand %p721_p10, %p715_p3 }
  0x1f   : > { %725 = shalt.err (!%p722_p9)
}
  0x20   : > { %s726_s11 = scalar_lea.vmem %s923_s18, 1024  ;;  %s809_s14 = smov [#allocation2]  }
  0x21   : > { %p727_p0 = scmp.ne.s32.totalorder %s923_s18, %s726_s11  ;;  %s731_s15 = sshll.u32 %s809_s14, 4  ;;  %s732_s15 = int_to_ptr.vmem [resolvable:$false] %s731_s15 }
  0x22   : > { %s733_s17 = scalar_lea.vmem %s732_s15, 2048  ;;  %p734_p11 = scmp.lt.s32.totalorder %s923_s18, %s732_s15 }
  0x23   : > { %p729_p2 = pnand %p727_p0, %p713_p1  ;;  %p735_p4 = scmp.lt.s32.totalorder %s733_s17, %s726_s11 }
  0x25   : > { %p730_p12 = pneg %p729_p2  ;;  %p736_p5 = por %p735_p4, %p734_p11 }
  0x27   : > { %p737_p7 = pnand %p736_p5, %p730_p12 }
  0x29   : > { %740 = shalt.err (!%p737_p7)
}
  0x2a   : > { %s810_s26 = smov 256   ;;  %s811_s28 = smov 16  }
  0x2b   : > { %640 = dma.hbm_to_vmem [thread:$0]  (!%p919_p13), %s915_s16, 1024, %s923_s18, %s925_s20, %s810_s26, %s810_s26, %s811_s28  }
  0x2c   : > { %p608_p9 = scmp.ge.s32.totalorder %s807_s24, 1  ;;  %p231_p1 = scmp.lt.s32.totalorder %s807_s24, 3 }
  0x2e   : > { %p232_p3 = pnand %p608_p9, %p231_p1 }
  0x2f   : > { %s956_s29 = sand.u32 (!%p232_p3), 1, %s799_s22  }
  0x30   : > { %235 = sbr.rel (%p232_p3) target bundleno = 563 (0x233), region = 44  ;;  %s609_s7 = sshll.u32 (!%p232_p3), %s956_s29, 6 }
  0x31   : > { %s238_s12 = scalar_lea.sflag (!%p232_p3), [#allocation3], %s956_s29  ;;  %s241_s13 = scalar_lea.vmem (!%p232_p3), [#allocation2], %s609_s7 }
  0x37   : > { %786 = dma.done.wait (%p895_p6), %s238_s12, 1024  }
  0x38   : > { %788 = vsyncadd (%p895_p6), %s238_s12, 4294966272  ;;  %v966_v0 = vld [vmem:[%s241_s13] sm:$0xff]  ;;  %v968_v1 = vld [vmem:[%s241_s13 + $0x8] sm:$0xff]  ;;  %v812_v15 = vmov 0.0   ;;  %vm376_vm0 = vcmask 261120   ;;  %vm302_vm1 = vcmask 15360   ;;  %v323_v44 = vlaneseq }
  0x39   : > { %v970_v2 = vld [vmem:[%s241_s13 + $0x20] sm:$0xff]  ;;  %v278_v3 = vadd.f32 %v968_v1, %v966_v0  ;;  %v974_v4 = vld [vmem:[%s241_s13 + $0x28] sm:$0xff]  ;;  %v976_v5 = vld [vmem:[%s241_s13 + $0x10] sm:$0xff]  ;;  %444 = vmatprep.mubr.f32.mxu0 %v812_v15  ;;  %s269_s18 = scalar_lea.vmem [#allocation5], %s609_s7  ;;  %s624_s19 = sshll.u32 %s873_s25, 10 }
  0x3a   : > { %v978_v6 = vld [vmem:[%s241_s13 + $0x18] sm:$0xff]  ;;  %v284_v7 = vadd.f32 %v974_v4, %v970_v2  ;;  %v982_v8 = vld [vmem:[%s241_s13 + $0x30] sm:$0xff]  ;;  %v627_v13 = vpack.c.bf16 %v976_v5, %v966_v0  ;;  %v375_v17 = vld [vmem:[%s1118_s5] sm:$0x1]  ;;  %v324_v47 = vshrl.u32 %v323_v44, 7  ;;  %s529_s20 = sshll.u32 %s269_s18, 4  ;;  %s1065_s14 = scalar_lea.hbm %s1119_s6, %s624_s19  ;;  %s1067_s20 = int_to_ptr.vmem [resolvable:$true] %s529_s20 }
  0x3b   : > { %v984_v9 = vld [vmem:[%s241_s13 + $0x38] sm:$0xff]  ;;  %279 = vadd.xlane.f32.xlu0 %v278_v3  ;;  %v281_v10 = vadd.f32 %v978_v6, %v976_v5  ;;  %v625_v12 = vpack.c.bf16 %v978_v6, %v968_v1  ;;  %v631_v16 = vpack.c.bf16 %v982_v8, %v970_v2  ;;  %v294_v21 = vld [vmem:[%s1114_s1] sm:$0xff]  ;;  %v296_v23 = vld [vmem:[%s1114_s1 + $0x10] sm:$0xff]  ;;  %s516_s25 = scalar_lea.sflag [#allocation4], %s956_s29  ;;  %s741_s15 = scalar_lea.vmem %s1067_s20, 1024 }
  0x3c   : > { %285 = vadd.xlane.f32.xlu1 %v284_v7  ;;  %v287_v11 = vadd.f32 %v984_v9, %v982_v8  ;;  %v629_v14 = vpack.c.bf16 %v984_v9, %v974_v4  ;;  %v295_v24 = vld [vmem:[%s1114_s1 + $0x8] sm:$0xff]  ;;  %v297_v28 = vld [vmem:[%s1114_s1 + $0x18] sm:$0xff]  ;;  %v316_v48 = vld [vmem:[%s1115_s2] sm:$0x1]  ;;  %v1020_v51 = vsub.s32 0, %v324_v47  ;;  %p742_p6 = scmp.ne.s32.totalorder %s1067_s20, %s741_s15  ;;  %p1126_p11 = scmp.ne.s32.totalorder %s1123_s9, 0 }
  0x3d   : > { %626 = vmatprep.subr.bf16.mxu0 %v625_v12  ;;  %v320_v53 = vld [vmem:[%s1116_s3 + $0x8] sm:$0xff]  ;;  %v319_v54 = vld [vmem:[%s1116_s3] sm:$0xff]  ;;  %v322_v56 = vld [vmem:[%s1116_s3 + $0x18] sm:$0xff]  ;;  %s814_s17 = smov [#allocation5]  }
  0x3e   : > { %628 = vmatpush1.bf16.msra.mxu0 %v627_v13  ;;  %v321_v57 = vld [vmem:[%s1116_s3 + $0x10] sm:$0xff]  ;;  %v344_v13 = vld [vmem:[%s1117_s4 + $0x8] sm:$0xff]  ;;  %p743_p12 = pnand %p742_p6, %p1126_p11  ;;  %s745_s26 = sshll.u32 %s814_s17, 4  ;;  %s746_s26 = int_to_ptr.vmem [resolvable:$false] %s745_s26 }
  0x3f   : > { %282 = vadd.xlane.f32.xlu0 %v281_v10  ;;  %630 = vmatprep.subr.bf16.mxu0 %v629_v14  ;;  %v813_v10 = vmov 0   ;;  %v343_v14 = vld [vmem:[%s1117_s4] sm:$0xff]  ;;  %s747_s28 = scalar_lea.vmem %s746_s26, 2048  ;;  %p748_p8 = scmp.lt.s32.totalorder %s1067_s20, %s746_s26 }
  0x40   : > { %288 = vadd.xlane.f32.xlu1 %v287_v11  ;;  %685 = vset.pattern.permute.xlu0 %v813_v10  ;;  %p744_p13 = pneg %p743_p12  ;;  %p749_p10 = scmp.lt.s32.totalorder %s747_s28, %s741_s15 }
  0x41   : > { %686 = vset.pattern.permute.xlu1 %v813_v10 }
  0x42   : > { %632 = vmatpush1.bf16.msra.mxu0 %v631_v16  ;;  %p750_p0 = por %p749_p10, %p748_p8 }
  0x44   : > { %p751_p2 = pnand %p750_p0, %p744_p13 }
  0x45   : > { %615 = vmatmul.mubr.msk.f32.vlgmr.msra.gmra.mrb[0].mxu0 %vm376_vm0, %v375_v17 }
  0xc8   : > { %v280_v18 = vpop.xlane.xlu0 %279 }
  0xc9   : > { %v290_v19 = vmul.f32 0.00390625, %v280_v18  ;;  %v286_v20 = vpop.xlane.xlu1 %285 }
  0xca   : > { %v292_v22 = vmul.f32 0.00390625, %v286_v20  ;;  %v345_v20 = vld [vmem:[%s1117_s4 + $0x10] sm:$0xff] }
  0xcb   : > { %v298_v26 = vmul.f32 %v294_v21, %v290_v19  ;;  %v346_v19 = vld [vmem:[%s1117_s4 + $0x18] sm:$0xff] }
  0xcc   : > { %v283_v25 = vpop.xlane.xlu0 %282  ;;  %v300_v31 = vmul.f32 %v296_v23, %v292_v22 }
  0xcd   : > { %v291_v27 = vmul.f32 0.00390625, %v283_v25  ;;  %v289_v29 = vpop.xlane.xlu1 %288  ;;  %v303_v34 = vsel %vm302_vm1, %v298_v26, 0.0 }
  0xce   : > { %v293_v30 = vmul.f32 0.00390625, %v289_v29  ;;  %v306_v37 = vsel %vm302_vm1, %v300_v31, 0.0 }
  0xcf   : > { %v299_v32 = vmul.f32 %v295_v24, %v291_v27 }
  0xd0   : > { %v301_v33 = vmul.f32 %v297_v28, %v293_v30 }
  0xd1   : > { %v304_v35 = vsel %vm302_vm1, %v299_v32, 0.0 }
  0xd2   : > { %v305_v36 = vadd.f32 %v304_v35, %v303_v34  ;;  %v308_v38 = vsel %vm302_vm1, %v301_v33, 0.0 }
  0xd4   : > { %v307_v39 = vadd.f32 %v306_v37, %v305_v36 }
  0xd6   : > { %v309_v40 = vadd.f32 %v308_v38, %v307_v39 }
  0xd8   : > { %v310_v41 = vrot.slane %v309_v40, 4 }
  0xda   : > { %v311_v42 = vadd.f32 %v310_v41, %v309_v40 }
  0xdc   : > { %v312_v43 = vrot.slane %v311_v42, 2 }
  0xde   : > { %v313_v45 = vadd.f32 %v312_v43, %v311_v42 }
  0xe0   : > { %v314_v46 = vrot.slane %v313_v45, 1 }
  0xe2   : > { %v315_v49 = vadd.f32 %v314_v46, %v313_v45 }
  0xe4   : > { %v317_v50 = vadd.f32 %v316_v48, %v315_v49 }
  0xe6   : > { %v318_v52 = vmax.f32 %v317_v50, 0.0 }
  0xe8   : > { %v326_v55 = vrot.slane %v318_v52, %v1020_v51 }
  0xea   : > { %v328_v58 = vmul.f32 %v326_v55, %v320_v53  ;;  %v327_v59 = vmul.f32 %v326_v55, %v319_v54  ;;  %v330_v62 = vmul.f32 %v326_v55, %v322_v56  ;;  %v329_v63 = vmul.f32 %v326_v55, %v321_v57 }
  0xec   : > { %v334_v60 = vsel %vm302_vm1, %v328_v58, 0.0  ;;  %v331_v61 = vsel %vm302_vm1, %v327_v59, 0.0  ;;  %v340_v3 = vsel %vm302_vm1, %v330_v62, 0.0  ;;  %v337_v7 = vsel %vm302_vm1, %v329_v63, 0.0 }
  0xed   : > { %335 = vadd.xlane.f32.xlu1 %v334_v60  ;;  %332 = vadd.xlane.f32.xlu0 %v331_v61 }
  0xf1   : > { %341 = vadd.xlane.f32.xlu1 %v340_v3  ;;  %338 = vadd.xlane.f32.xlu0 %v337_v7 }
 0x118   : > { %v446_v11 = vpop.f32.mrb[0].mxu0 }
 0x119   : > { %v448_v12 = vpop.f32.mrb[1].mxu0  ;;  %v616_v41 = vmul.f32 -1.442695, %v446_v11 }
 0x11a   : > { %v617_v42 = vmul.f32 -1.442695, %v448_v12 }
 0x17a   : > { %v336_v15 = vpop.xlane.xlu1 %335  ;;  %v333_v16 = vpop.xlane.xlu0 %332 }
 0x17b   : > { %v348_v17 = vadd.f32 %v344_v13, %v336_v15  ;;  %v347_v18 = vadd.f32 %v343_v14, %v333_v16 }
 0x17d   : > { %v612_v21 = vmul.f32 -1.442695, %v348_v17  ;;  %v611_v22 = vmul.f32 -1.442695, %v347_v18 }
 0x17e   : > { %v342_v23 = vpop.xlane.xlu1 %341  ;;  %v339_v24 = vpop.xlane.xlu0 %338 }
 0x17f   : > { %687 = vpow2.f32 %v612_v21  ;;  %v350_v25 = vadd.f32 %v346_v19, %v342_v23  ;;  %v349_v26 = vadd.f32 %v345_v20, %v339_v24 }
 0x180   : > { %689 = vpow2.f32 %v611_v22 }
 0x181   : > { %v614_v27 = vmul.f32 -1.442695, %v350_v25  ;;  %v613_v28 = vmul.f32 -1.442695, %v349_v26 }
 0x183   : > { %691 = vpow2.f32 %v614_v27 }
 0x184   : > { %693 = vpow2.f32 %v613_v28 }
 0x189   : > { %v688_v29 = vpop.eup %687 }
 0x18a   : > { %v690_v30 = vpop.eup %689  ;;  %v364_v31 = vadd.f32 1.0, %v688_v29 }
 0x18b   : > { %v363_v32 = vadd.f32 1.0, %v690_v30 }
 0x18c   : > { %695 = vrcp.f32 %v364_v31 }
 0x18d   : > { %v692_v33 = vpop.eup %691  ;;  %697 = vrcp.f32 %v363_v32 }
 0x18e   : > { %v694_v34 = vpop.eup %693  ;;  %v366_v36 = vadd.f32 1.0, %v692_v33 }
 0x18f   : > { %v365_v35 = vadd.f32 1.0, %v694_v34 }
 0x191   : > { %699 = vrcp.f32 %v365_v35 }
 0x192   : > { %701 = vrcp.f32 %v366_v36 }
 0x193   : > { %703 = vpow2.f32 %v616_v41 }
 0x194   : > { %705 = vpow2.f32 %v617_v42 }
 0x196   : > { %v696_v37 = vpop.eup %695 }
 0x197   : > { %v698_v38 = vpop.eup %697  ;;  %470 = vperm.xlu1 %686, %v696_v37  }
 0x198   : > { %465 = vperm.xlu0 %685, %v698_v38  }
 0x19b   : > { %v700_v39 = vpop.eup %699 }
 0x19c   : > { %475 = vperm.xlu1 %686, %v700_v39   ;;  %v702_v40 = vpop.eup %701 }
 0x19d   : > { %v704_v43 = vpop.eup %703 }
 0x19e   : > { %v706_v44 = vpop.eup %705  ;;  %v457_v45 = vadd.f32 1.0, %v704_v43 }
 0x19f   : > { %v458_v46 = vadd.f32 1.0, %v706_v44 }
 0x1a0   : > { %480 = vperm.xlu1 %686, %v702_v40   ;;  %707 = vrcp.f32 %v457_v45 }
 0x1a1   : > { %709 = vrcp.f32 %v458_v46 }
 0x1aa   : > { %v708_v47 = vpop.eup %707 }
 0x1ab   : > { %v710_v48 = vpop.eup %709  ;;  %v486_v49 = vrot.slane %v708_v47, %v1020_v51 }
 0x1ac   : > { %v490_v50 = vrot.slane %v710_v48, %v1020_v51 }
 0x216   : > { %v471_v52 = vpop.permute.xlu1 %470 }
 0x217   : > { %v493_v53 = vadd.f32 %v486_v49, %v471_v52  ;;  %v494_v54 = vadd.f32 %v490_v50, %v471_v52  ;;  %v466_v55 = vpop.permute.xlu0 %465 }
 0x218   : > { %v491_v56 = vadd.f32 %v486_v49, %v466_v55  ;;  %v492_v57 = vadd.f32 %v490_v50, %v466_v55 }
 0x219   : > { %v501_v58 = vmul.f32 %v493_v53, %v976_v5  ;;  %v502_v59 = vmul.f32 %v494_v54, %v978_v6 }
 0x21a   : > { %v499_v60 = vmul.f32 %v491_v56, %v966_v0  ;;  %v500_v61 = vmul.f32 %v492_v57, %v968_v1 }
 0x21b   : > { %509 = vst [vmem:[%s269_s18 + $0x10] sm:$0xff] %v501_v58  ;;  %510 = vst [vmem:[%s269_s18 + $0x18] sm:$0xff] %v502_v59  ;;  %v476_v51 = vpop.permute.xlu1 %475 }
 0x21c   : > { %507 = vst [vmem:[%s269_s18] sm:$0xff] %v499_v60  ;;  %508 = vst [vmem:[%s269_s18 + $0x8] sm:$0xff] %v500_v61  ;;  %v495_v62 = vadd.f32 %v486_v49, %v476_v51  ;;  %v496_v63 = vadd.f32 %v490_v50, %v476_v51 }
 0x21e   : > { %v503_v3 = vmul.f32 %v495_v62, %v970_v2  ;;  %v504_v5 = vmul.f32 %v496_v63, %v974_v4 }
 0x21f   : > { %v481_v0 = vpop.permute.xlu1 %480 }
 0x220   : > { %511 = vst [vmem:[%s269_s18 + $0x20] sm:$0xff] %v503_v3  ;;  %512 = vst [vmem:[%s269_s18 + $0x28] sm:$0xff] %v504_v5  ;;  %v497_v1 = vadd.f32 %v486_v49, %v481_v0  ;;  %v498_v6 = vadd.f32 %v490_v50, %v481_v0 }
 0x222   : > { %v505_v2 = vmul.f32 %v497_v1, %v982_v8  ;;  %v506_v4 = vmul.f32 %v498_v6, %v984_v9 }
 0x224   : > { %513 = vst [vmem:[%s269_s18 + $0x30] sm:$0xff] %v505_v2  ;;  %514 = vst [vmem:[%s269_s18 + $0x38] sm:$0xff] %v506_v4 }
 0x225   : > { %754 = shalt.err (!%p751_p2)
}
 0x226   : > { %s755_s12 = scalar_lea.hbm %s1065_s14, 1024  ;;  %s759_s16 = scalar_lea.hbm %s1119_s6, 2048 }
 0x227   : > { %p756_p4 = scmp.ne.s32.totalorder %s1065_s14, %s755_s12  ;;  %p760_p9 = scmp.lt.u32.totalorder %s1065_s14, %s1119_s6 }
 0x228   : > { %p761_p1 = scmp.lt.u32.totalorder %s759_s16, %s755_s12  ;;  %p763_p6 = scmp.lt.u32.totalorder %s755_s12, %s1065_s14 }
 0x229   : > { %p757_p5 = pnand %p756_p4, %p1126_p11 }
 0x22a   : > { %p762_p3 = por %p761_p1, %p760_p9 }
 0x22b   : > { %p758_p7 = pneg %p757_p5 }
 0x22c   : > { %p764_p12 = por %p763_p6, %p762_p3 }
 0x22e   : > { %p765_p13 = pnand %p764_p12, %p758_p7 }
 0x230   : > { %768 = shalt.err (!%p765_p13)
}
 0x231   : > { %s815_s7 = smov 256   ;;  %s816_s11 = smov 16  }
 0x232   : > { %635 = dma.vmem_to_hbm [thread:$0]  (%p1126_p11), %s1067_s20, 1024, %s1065_s14, %s516_s25, %s815_s7, %s815_s7, %s816_s11  }
 0x233 PF: > { %s544_s15 = sand.u32 1, %s795_s21   ;;  %p1127_p8 = scmp.ne.s32.totalorder %s1124_s10, 0 }
 0x234   : > { %p1128_p10 = scmp.ge.s32.totalorder %s807_s24, 2  ;;  %s545_s17 = scalar_lea.sflag [#allocation4], %s544_s15 }
 0x236   : > { %p642_p0 = pnand %p1128_p10, %p1127_p8 }
 0x238   : > { %790 = dma.done.wait (!%p642_p0), %s545_s17, 1024  }
 0x239   : > { %792 = vsyncadd (!%p642_p0), %s545_s17, 4294966272  ;;  %p19_p2 = scmp.ge.s32.totalorder %s877_s27, 4   ;;  %s1129_s21 = smov %s799_s22 }
 0x23a   : > { %s1130_s22 = smov %s803_s23  ;;  %s1131_s23 = smov %s889_s30 }
 0x23b   : > { %s1132_s24 = smov %s877_s27  ;;  %21 = sbr.rel (!%p19_p2) target bundleno = 5 (0x5), region = 89 }
 0x242   :  { %550 = vsyncpa [#allocation3], 1 }
 0x243   :  { %552 = vsyncpa [#allocation3 + $0x1], 1 }
 0x244   :  { %553 = vsyncpa [#allocation4], 1 }
 0x245   :  { %555 = vsyncpa [#allocation4 + $0x1], 1 }

</bundles_post_ra>
